<compile_context>
chip_gen: v6e
topology: v6e:2x2x1
jax: 0.10.0
libtpu: 0.0.40
codegen_flags: <defaults>
</compile_context>

<pallas_src>
import functools

import jax
import jax.numpy as jnp
from jax.experimental import pallas as pl
from jax.experimental.pallas import tpu as pltpu

LANE = 128
SUBLANE = 8


def _round_up(x, m):
    return ((x + m - 1) // m) * m


def decoder_kernel(z_ref, w1_ref, b1_ref, w2_ref, b2_ref, out_ref):
    # Layer 1: Linear(z_dim -> H) + tanh.  bf16 operands, f32 accumulation.
    h = jnp.dot(z_ref[...], w1_ref[...], preferred_element_type=jnp.float32)
    h = jnp.tanh(h + b1_ref[...])
    # Layer 2: Linear(H -> 784) + sigmoid.  Cast h to bf16 for the MXU;
    # bias add in f32.
    logits = jnp.dot(h.astype(w2_ref.dtype), w2_ref[...],
                     preferred_element_type=jnp.float32)
    x = logits + b2_ref[...]
    # sigmoid(x) == 0.5 * (tanh(x/2) + 1): single EUP transcendental per
    # element instead of exp + divide.
    mean = 0.5 * (jnp.tanh(0.5 * x) + 1.0)
    out_ref[...] = mean.astype(out_ref.dtype)


def prepare_decoder_params(w1, b1, w2, b2):
    """Pad contraction dims to friendly multiples and cast weights to bf16.

    Inputs follow [in, out] layout (already transposed vs. PyTorch):
      w1: [z_dim, H], b1: [H], w2: [H, out_dim], b2: [out_dim].
    Padding: z_dim 20 -> 32 (zero rows, matched by zero cols in z),
    hidden 500 -> 512 (zero cols in w1 -> tanh(0)=0 -> zero rows in w2),
    so padding never affects the real 784 outputs.  The output dim itself is
    NOT padded: the kernel stores exactly 784 columns.
    """
    z_dim, hidden = w1.shape
    out_dim = w2.shape[1]
    z_dim_p = _round_up(max(z_dim, 16), 16)   # 20 -> 32 (bf16 sublane packing)
    hidden_p = _round_up(hidden, LANE)        # 500 -> 512

    w1p = jnp.zeros((z_dim_p, hidden_p), jnp.bfloat16)
    w1p = w1p.at[:z_dim, :hidden].set(w1.astype(jnp.bfloat16))
    b1p = jnp.zeros((1, hidden_p), jnp.float32)
    b1p = b1p.at[:, :hidden].set(b1.reshape(1, -1).astype(jnp.float32))
    w2p = jnp.zeros((hidden_p, out_dim), jnp.bfloat16)
    w2p = w2p.at[:hidden, :].set(w2.astype(jnp.bfloat16))
    b2p = b2.reshape(1, -1).astype(jnp.float32)
    return w1p, b1p, w2p, b2p, out_dim


def _choose_tiling(batch, max_tile):
    """Pick (tile_b, n_tiles): tile_b multiple of 8, low padding waste,
    >= 2 tiles whenever batch >= 16 (so v7x megacore gets work on both TCs)."""
    max_tile = max(_round_up(max_tile, SUBLANE), SUBLANE)
    b8 = _round_up(batch, SUBLANE)
    if b8 < 2 * SUBLANE:
        return b8, 1
    n_tiles = max(2, pl.cdiv(b8, max_tile))
    tile_b = _round_up(pl.cdiv(b8, n_tiles), SUBLANE)
    return tile_b, n_tiles


@functools.partial(jax.jit, static_argnames=("max_tile", "out_dtype"))
def decoder_forward(z, w1p, b1p, w2p, b2p, max_tile=1024,
                    out_dtype=jnp.bfloat16):
    """z: [B, z_dim] f32; padded params from prepare_decoder_params.

    Returns [B, 784] in `out_dtype` (bf16 by default to halve the output
    HBM writeback; pass out_dtype=jnp.float32 if the consumer needs f32)."""
    B, z_dim = z.shape
    z_dim_p, hidden_p = w1p.shape
    out_dim = w2p.shape[1]

    tile_b, n_tiles = _choose_tiling(B, max_tile)
    b_pad = tile_b * n_tiles

    # Zero-pad batch rows and z_dim columns, cast to bf16 for the MXU.
    z = jnp.pad(z, ((0, b_pad - B), (0, z_dim_p - z_dim))).astype(jnp.bfloat16)

    cost = pl.CostEstimate(
        flops=2 * b_pad * (z_dim_p * hidden_p + hidden_p * out_dim),
        transcendentals=b_pad * (hidden_p + out_dim),
        bytes_accessed=(z.size * 2 + w1p.size * 2 + w2p.size * 2
                        + b1p.size * 4 + b2p.size * 4
                        + b_pad * out_dim * jnp.dtype(out_dtype).itemsize),
    )

    out_padded = pl.pallas_call(
        decoder_kernel,
        out_shape=jax.ShapeDtypeStruct((b_pad, out_dim), out_dtype),
        grid=(n_tiles,),
        in_specs=[
            # z tile marches with the batch grid axis.
            pl.BlockSpec((tile_b, z_dim_p), lambda i: (i, 0)),
            # Weights / biases: constant block index -> VMEM-resident across
            # grid steps (fetched from HBM once).
            pl.BlockSpec(w1p.shape, lambda i: (0, 0)),
            pl.BlockSpec(b1p.shape, lambda i: (0, 0)),
            pl.BlockSpec(w2p.shape, lambda i: (0, 0)),
            pl.BlockSpec(b2p.shape, lambda i: (0, 0)),
        ],
        # Last block dim (784) equals the full array dim -> layout-legal; no
        # post-kernel column slice is needed.
        out_specs=pl.BlockSpec((tile_b, out_dim), lambda i: (i, 0)),
        compiler_params=pltpu.CompilerParams(
            dimension_semantics=("parallel",),  # v7x: shard batch over 2 TCs
        ),
        cost_estimate=cost,
    )(z, w1p, b1p, w2p, b2p)

    # Only the (cheap) batch-row slice remains; it's a no-op when b_pad == B.
    return out_padded if b_pad == B else out_padded[:B]


def init_params(key, z_dim=20, hidden_dim=500, out_dim=784):
    """PyTorch nn.Linear-style init: U(-1/sqrt(fan_in), 1/sqrt(fan_in)).

    Weights are stored pre-transposed to [in, out]."""
    k1, k2, k3, k4 = jax.random.split(key, 4)
    bound1 = 1.0 / (z_dim ** 0.5)
    bound2 = 1.0 / (hidden_dim ** 0.5)
    w1 = jax.random.uniform(k1, (z_dim, hidden_dim), jnp.float32, -bound1, bound1)
    b1 = jax.random.uniform(k2, (hidden_dim,), jnp.float32, -bound1, bound1)
    w2 = jax.random.uniform(k3, (hidden_dim, out_dim), jnp.float32, -bound2, bound2)
    b2 = jax.random.uniform(k4, (out_dim,), jnp.float32, -bound2, bound2)
    return w1, b1, w2, b2


if __name__ == "__main__":
    key = jax.random.PRNGKey(0)
    kz, kp = jax.random.split(key)

    batch, z_dim, hidden_dim, out_dim = 4, 20, 500, 784
    z = jax.random.normal(kz, (batch, z_dim), jnp.float32)
    w1, b1, w2, b2 = init_params(kp, z_dim, hidden_dim, out_dim)

    w1p, b1p, w2p, b2p, out_dim = prepare_decoder_params(w1, b1, w2, b2)
    mean = decoder_forward(z, w1p, b1p, w2p, b2p)
    mean = jax.block_until_ready(mean)
    assert mean.shape == (batch, out_dim), mean.shape

    # Reference in plain JAX with the same bf16 parameter/activation rounding
    # (f32 accumulation), so the comparison isolates kernel correctness.
    z_bf = z.astype(jnp.bfloat16).astype(jnp.float32)
    w1_bf = w1.astype(jnp.bfloat16).astype(jnp.float32)
    w2_bf = w2.astype(jnp.bfloat16).astype(jnp.float32)
    h_ref = jnp.tanh(
        jnp.dot(z_bf, w1_bf, precision=jax.lax.Precision.HIGHEST) + b1)
    h_ref = h_ref.astype(jnp.bfloat16).astype(jnp.float32)
    mean_ref = jax.nn.sigmoid(
        jnp.dot(h_ref, w2_bf, precision=jax.lax.Precision.HIGHEST) + b2)

    err = float(jnp.max(jnp.abs(mean.astype(jnp.float32) - mean_ref)))
    # Tolerance covers the bf16 output rounding plus the tanh-form sigmoid.
    assert err < 1e-2, err

    print("KERNEL_OK")
</pallas_src>

<mosaic_0001>
module attributes {stable_mosaic.version = 11 : i64} {
  func.func @decoder_kernel(%arg0: i32, %arg1: memref<8x32xbf16, #tpu.memory_space<vmem>>, %arg2: memref<32x512xbf16, #tpu.memory_space<vmem>>, %arg3: memref<1x512xf32, #tpu.memory_space<vmem>>, %arg4: memref<512x784xbf16, #tpu.memory_space<vmem>>, %arg5: memref<1x784xf32, #tpu.memory_space<vmem>>, %arg6: memref<8x784xbf16, #tpu.memory_space<vmem>>) attributes {dimension_semantics = [#tpu.dimension_semantics<parallel>], iteration_bounds = array<i64: 1>, scalar_prefetch = 0 : i64, scratch_operands = 0 : i64, tpu.core_type = #tpu.core_type<tc>, window_params = [{transform_indices = @transform_0, window_bounds = array<i64: 8, 32>}, {pipeline_mode = #tpu.pipeline_mode<synchronous>, transform_indices = @transform_1, window_bounds = array<i64: 32, 512>}, {pipeline_mode = #tpu.pipeline_mode<synchronous>, transform_indices = @transform_2, window_bounds = array<i64: 1, 512>}, {pipeline_mode = #tpu.pipeline_mode<synchronous>, transform_indices = @transform_3, window_bounds = array<i64: 512, 784>}, {pipeline_mode = #tpu.pipeline_mode<synchronous>, transform_indices = @transform_4, window_bounds = array<i64: 1, 784>}, {transform_indices = @transform_5, window_bounds = array<i64: 8, 784>}]} {
    %c0 = arith.constant 0 : index
    %c0_0 = arith.constant 0 : index
    %0 = vector.load %arg1[%c0, %c0_0] : memref<8x32xbf16, #tpu.memory_space<vmem>>, vector<8x32xbf16>
    %c0_1 = arith.constant 0 : index
    %c0_2 = arith.constant 0 : index
    %1 = vector.load %arg2[%c0_1, %c0_2] : memref<32x512xbf16, #tpu.memory_space<vmem>>, vector<32x512xbf16>
    %cst = arith.constant dense<0.000000e+00> : vector<8x512xf32>
    %2 = tpu.matmul %0, %1, %cst {dimension_numbers = #tpu.dot_dimension_numbers<[1], [0], [0], [1], [0, 0, 1, 1], [], []>} : vector<8x32xbf16>, vector<32x512xbf16>, vector<8x512xf32> -> vector<8x512xf32>
    %c0_3 = arith.constant 0 : index
    %c0_4 = arith.constant 0 : index
    %3 = vector.load %arg3[%c0_3, %c0_4] : memref<1x512xf32, #tpu.memory_space<vmem>>, vector<1x512xf32>
    %4 = vector.broadcast %3 : vector<1x512xf32> to vector<8x512xf32>
    %5 = arith.addf %2, %4 : vector<8x512xf32>
    %6 = math.tanh %5 : vector<8x512xf32>
    %7 = arith.truncf %6 : vector<8x512xf32> to vector<8x512xbf16>
    %c0_5 = arith.constant 0 : index
    %c0_6 = arith.constant 0 : index
    %8 = vector.load %arg4[%c0_5, %c0_6] : memref<512x784xbf16, #tpu.memory_space<vmem>>, vector<512x784xbf16>
    %cst_7 = arith.constant dense<0.000000e+00> : vector<8x784xf32>
    %9 = tpu.matmul %7, %8, %cst_7 {dimension_numbers = #tpu.dot_dimension_numbers<[1], [0], [0], [1], [0, 0, 1, 1], [], []>} : vector<8x512xbf16>, vector<512x784xbf16>, vector<8x784xf32> -> vector<8x784xf32>
    %c0_8 = arith.constant 0 : index
    %c0_9 = arith.constant 0 : index
    %10 = vector.load %arg5[%c0_8, %c0_9] : memref<1x784xf32, #tpu.memory_space<vmem>>, vector<1x784xf32>
    %11 = vector.broadcast %10 : vector<1x784xf32> to vector<8x784xf32>
    %12 = arith.addf %9, %11 : vector<8x784xf32>
    %cst_10 = arith.constant 5.000000e-01 : f32
    %13 = vector.broadcast %cst_10 : f32 to vector<8x784xf32>
    %14 = arith.mulf %13, %12 : vector<8x784xf32>
    %15 = math.tanh %14 : vector<8x784xf32>
    %cst_11 = arith.constant 1.000000e+00 : f32
    %16 = vector.broadcast %cst_11 : f32 to vector<8x784xf32>
    %17 = arith.addf %15, %16 : vector<8x784xf32>
    %cst_12 = arith.constant 5.000000e-01 : f32
    %18 = vector.broadcast %cst_12 : f32 to vector<8x784xf32>
    %19 = arith.mulf %18, %17 : vector<8x784xf32>
    %20 = arith.truncf %19 : vector<8x784xf32> to vector<8x784xbf16>
    %c0_13 = arith.constant 0 : index
    %c0_14 = arith.constant 0 : index
    %21 = vector.load %arg6[%c0_13, %c0_14] : memref<8x784xbf16, #tpu.memory_space<vmem>>, vector<8x784xbf16>
    tpu.vector_store %arg6[%c0_13, %c0_14], %20 {strides = array<i32>} : memref<8x784xbf16, #tpu.memory_space<vmem>>, vector<8x784xbf16>,
    return
  }
  func.func @transform_0(%arg0: i32) -> (i32, i32) {
    %c0_i32 = arith.constant 0 : i32
    %c0_i32_0 = arith.constant 0 : i32
    return %arg0, %c0_i32 : i32, i32
  }
  func.func @transform_1(%arg0: i32) -> (i32, i32) {
    %c0_i32 = arith.constant 0 : i32
    %c0_i32_0 = arith.constant 0 : i32
    %c0_i32_1 = arith.constant 0 : i32
    return %c0_i32, %c0_i32_0 : i32, i32
  }
  func.func @transform_2(%arg0: i32) -> (i32, i32) {
    %c0_i32 = arith.constant 0 : i32
    %c0_i32_0 = arith.constant 0 : i32
    %c0_i32_1 = arith.constant 0 : i32
    return %c0_i32, %c0_i32_0 : i32, i32
  }
  func.func @transform_3(%arg0: i32) -> (i32, i32) {
    %c0_i32 = arith.constant 0 : i32
    %c0_i32_0 = arith.constant 0 : i32
    %c0_i32_1 = arith.constant 0 : i32
    return %c0_i32, %c0_i32_0 : i32, i32
  }
  func.func @transform_4(%arg0: i32) -> (i32, i32) {
    %c0_i32 = arith.constant 0 : i32
    %c0_i32_0 = arith.constant 0 : i32
    %c0_i32_1 = arith.constant 0 : i32
    return %c0_i32, %c0_i32_0 : i32, i32
  }
  func.func @transform_5(%arg0: i32) -> (i32, i32) {
    %c0_i32 = arith.constant 0 : i32
    %c0_i32_0 = arith.constant 0 : i32
    return %arg0, %c0_i32 : i32, i32
  }
}

</mosaic_0001>

<bundles_post_ra>
// kernel: decoder_forward.1
= control target key start
LH: loop header
LB: loop body
LE: loop exit
PB: predicated region body
PF: predicated region fallthrough
CT: control target
= control target key end

     0   :  { %v2664_v1 = vmov 0   ;;  %vm92_vm0 = vcmask 261120   ;;  %vm2017_vm1 = vcmask 125952   ;;  %s3470_s1 = inlined_call_operand.vmem [shape: bf16[32,512], index: 1, kind: input, shape index: {}]   ;;  %s3471_s0 = inlined_call_operand.vmem [shape: bf16[8,32], index: 0, kind: input, shape index: {}]   ;;  %s3472_s3 = inlined_call_operand.vmem [shape: bf16[512,784], index: 3, kind: input, shape index: {}]   ;;  %s3473_s2 = inlined_call_operand.vmem [shape: f32[1,512], index: 2, kind: input, shape index: {}]   ;;  %s3474_s4 = inlined_call_operand.vmem [shape: f32[1,784], index: 4, kind: input, shape index: {}]   ;;  %s3475_s5 = inlined_call_operand.vmem [shape: bf16[8,784], index: 5, kind: output, shape index: {}]  }
   0x1   :  { %v2310_v0 = vld [vmem:[%s3470_s1 + $0x24] ss:$16 sps:$4 sm:$0xff]   ;;  %128 = vmatprep.mubr.bf16.mxu0 %v2664_v1  ;;  %169 = vmatprep.mubr.bf16.mxu1 %v2664_v1  ;;  %v2312_v2 = vld [vmem:[%s3470_s1 + $0x2c] ss:$16 sps:$4 sm:$0xff]   ;;  %v2314_v3 = vld [vmem:[%s3470_s1 + $0x20] ss:$16 sps:$4 sm:$0xff]  }
   0x2   :  { %108 = vmatprep.subr.bf16.mxu0 %v2310_v0  ;;  %v2315_v4 = vld [vmem:[%s3470_s1 + $0x28] ss:$16 sps:$4 sm:$0xff]   ;;  %149 = vmatprep.subr.bf16.mxu1 %v2312_v2  ;;  %v2316_v5 = vld [vmem:[%s3470_s1 + $0x4] ss:$16 sps:$4 sm:$0xff]   ;;  %v2318_v6 = vld [vmem:[%s3470_s1 + $0xc] ss:$16 sps:$4 sm:$0xff]  }
   0x3   :  { %109 = vmatpush1.bf16.msra.mxu0 %v2314_v3  ;;  %150 = vmatpush1.bf16.msra.mxu1 %v2315_v4  ;;  %v2320_v7 = vld [vmem:[%s3470_s1] ss:$16 sps:$4 sm:$0xff]   ;;  %v2321_v8 = vld [vmem:[%s3470_s1 + $0x8] ss:$16 sps:$4 sm:$0xff]  }
   0x4   :  { %110 = vmatprep.subr.bf16.mxu0 %v2316_v5  ;;  %151 = vmatprep.subr.bf16.mxu1 %v2318_v6  ;;  %v21_v9 = vld [vmem:[%s3471_s0] sm:$0xf]  ;;  %v2322_v10 = vld [vmem:[%s3472_s3 + $0x188] ss:$28 sps:$4 sm:$0xff]   ;;  %v2330_v14 = vld [vmem:[%s3472_s3 + $0x154] ss:$28 sps:$4 sm:$0xff]  }
   0x5   :  { %v2324_v11 = vld [vmem:[%s3472_s3 + $0x18c] ss:$28 sps:$4 sm:$0xff]   ;;  %v2333_v15 = vld [vmem:[%s3472_s3 + $0x4d4] ss:$28 sps:$4 sm:$0xff]   ;;  %v2336_v18 = vld [vmem:[%s3472_s3 + $0x11c] ss:$28 sps:$4 sm:$0xff]  }
   0x6   :  { %v2325_v12 = vld [vmem:[%s3472_s3 + $0x508] ss:$28 sps:$4 sm:$0xff]   ;;  %v2328_v16 = vld [vmem:[%s3472_s3 + $0x150] ss:$28 sps:$4 sm:$0xff]   ;;  %v2339_v19 = vld [vmem:[%s3472_s3 + $0x49c] ss:$28 sps:$4 sm:$0xff]  }
   0x7   :  { %111 = vmatpush1.bf16.msra.mxu0 %v2320_v7  ;;  %152 = vmatpush1.bf16.msra.mxu1 %v2321_v8  ;;  %v2327_v13 = vld [vmem:[%s3472_s3 + $0x50c] ss:$28 sps:$4 sm:$0xff]   ;;  %v2334_v20 = vld [vmem:[%s3472_s3 + $0x118] ss:$28 sps:$4 sm:$0xff]   ;;  %v2342_v22 = vld [vmem:[%s3472_s3 + $0xe4] ss:$28 sps:$4 sm:$0xff]  }
   0x8   :  { %1631 = vmatprep.subr.bf16.mxu0 %v2324_v11  ;;  %1672 = vmatprep.subr.bf16.mxu1 %v2327_v13  ;;  %v2331_v17 = vld [vmem:[%s3472_s3 + $0x4d0] ss:$28 sps:$4 sm:$0xff]   ;;  %v2337_v21 = vld [vmem:[%s3472_s3 + $0x498] ss:$28 sps:$4 sm:$0xff]   ;;  %v2345_v23 = vld [vmem:[%s3472_s3 + $0x464] ss:$28 sps:$4 sm:$0xff]  }
   0x9   :  { %v2340_v24 = vld [vmem:[%s3472_s3 + $0xe0] ss:$28 sps:$4 sm:$0xff]   ;;  %v2348_v26 = vld [vmem:[%s3472_s3 + $0xac] ss:$28 sps:$4 sm:$0xff]   ;;  %v2354_v30 = vld [vmem:[%s3472_s3 + $0x74] ss:$28 sps:$4 sm:$0xff]  }
   0xa   :  { %2031 = vmatmul.mubr.msk.bf16.vlgmr.msra.gmra.mxu0 %vm92_vm0, %v21_v9  ;;  %2032 = vmatmul.mubr.msk.bf16.vlgmr.msra.gmra.mxu1 %vm92_vm0, %v21_v9  ;;  %v2343_v25 = vld [vmem:[%s3472_s3 + $0x460] ss:$28 sps:$4 sm:$0xff]   ;;  %v2351_v27 = vld [vmem:[%s3472_s3 + $0x42c] ss:$28 sps:$4 sm:$0xff]   ;;  %v2357_v31 = vld [vmem:[%s3472_s3 + $0x3f4] ss:$28 sps:$4 sm:$0xff]  }
   0xb   :  { %1632 = vmatpush1.bf16.msra.mxu0 %v2322_v10  ;;  %1673 = vmatpush1.bf16.msra.mxu1 %v2325_v12  ;;  %v2346_v28 = vld [vmem:[%s3472_s3 + $0xa8] ss:$28 sps:$4 sm:$0xff]   ;;  %v2352_v32 = vld [vmem:[%s3472_s3 + $0x70] ss:$28 sps:$4 sm:$0xff]   ;;  %v2360_v34 = vld [vmem:[%s3472_s3 + $0x3c] ss:$28 sps:$4 sm:$0xff]   ;;  %v32_v12 = vlaneseq }
   0xc   :  { %1633 = vmatprep.subr.bf16.mxu0 %v2330_v14  ;;  %1674 = vmatprep.subr.bf16.mxu1 %v2333_v15  ;;  %v2349_v29 = vld [vmem:[%s3472_s3 + $0x428] ss:$28 sps:$4 sm:$0xff]   ;;  %v2355_v33 = vld [vmem:[%s3472_s3 + $0x3f0] ss:$28 sps:$4 sm:$0xff]   ;;  %v2363_v35 = vld [vmem:[%s3472_s3 + $0x3bc] ss:$28 sps:$4 sm:$0xff]  }
   0xd   :  { %v2358_v36 = vld [vmem:[%s3472_s3 + $0x38] ss:$28 sps:$4 sm:$0xff]   ;;  %v2366_v38 = vld [vmem:[%s3472_s3 + $0x4] ss:$28 sps:$4 sm:$0xff]   ;;  %v2372_v42 = vld [vmem:[%s3472_s3 + $0x34c] ss:$28 sps:$4 sm:$0xff]  }
   0xe   :  { %v2361_v37 = vld [vmem:[%s3472_s3 + $0x3b8] ss:$28 sps:$4 sm:$0xff]   ;;  %v2369_v39 = vld [vmem:[%s3472_s3 + $0x384] ss:$28 sps:$4 sm:$0xff]   ;;  %v2375_v43 = vld [vmem:[%s3472_s3 + $0x6cc] ss:$28 sps:$4 sm:$0xff]  }
   0xf   :  { %1634 = vmatpush1.bf16.msra.mxu0 %v2328_v16  ;;  %1675 = vmatpush1.bf16.msra.mxu1 %v2331_v17  ;;  %v2364_v40 = vld [vmem:[%s3472_s3] ss:$28 sps:$4 sm:$0xff]   ;;  %v2370_v44 = vld [vmem:[%s3472_s3 + $0x348] ss:$28 sps:$4 sm:$0xff]   ;;  %v2378_v46 = vld [vmem:[%s3472_s3 + $0x314] ss:$28 sps:$4 sm:$0xff]  }
  0x10   :  { %1635 = vmatprep.subr.bf16.mxu0 %v2336_v18  ;;  %1676 = vmatprep.subr.bf16.mxu1 %v2339_v19  ;;  %v2367_v41 = vld [vmem:[%s3472_s3 + $0x380] ss:$28 sps:$4 sm:$0xff]   ;;  %v2373_v45 = vld [vmem:[%s3472_s3 + $0x6c8] ss:$28 sps:$4 sm:$0xff]   ;;  %v2381_v47 = vld [vmem:[%s3472_s3 + $0x694] ss:$28 sps:$4 sm:$0xff]  }
  0x11   :  { %v2376_v48 = vld [vmem:[%s3472_s3 + $0x310] ss:$28 sps:$4 sm:$0xff]   ;;  %v2384_v50 = vld [vmem:[%s3472_s3 + $0x2dc] ss:$28 sps:$4 sm:$0xff]   ;;  %v2390_v54 = vld [vmem:[%s3472_s3 + $0x2a4] ss:$28 sps:$4 sm:$0xff]  }
  0x12   :  { %v2379_v49 = vld [vmem:[%s3472_s3 + $0x690] ss:$28 sps:$4 sm:$0xff]   ;;  %v2387_v51 = vld [vmem:[%s3472_s3 + $0x65c] ss:$28 sps:$4 sm:$0xff]   ;;  %v2393_v55 = vld [vmem:[%s3472_s3 + $0x624] ss:$28 sps:$4 sm:$0xff]  }
  0x13   :  { %1636 = vmatpush1.bf16.msra.mxu0 %v2334_v20  ;;  %1677 = vmatpush1.bf16.msra.mxu1 %v2337_v21  ;;  %v2382_v52 = vld [vmem:[%s3472_s3 + $0x2d8] ss:$28 sps:$4 sm:$0xff]   ;;  %v2388_v56 = vld [vmem:[%s3472_s3 + $0x2a0] ss:$28 sps:$4 sm:$0xff]   ;;  %v2396_v58 = vld [vmem:[%s3472_s3 + $0x26c] ss:$28 sps:$4 sm:$0xff]  }
  0x14   :  { %1637 = vmatprep.subr.bf16.mxu0 %v2342_v22  ;;  %1678 = vmatprep.subr.bf16.mxu1 %v2345_v23  ;;  %v2385_v53 = vld [vmem:[%s3472_s3 + $0x658] ss:$28 sps:$4 sm:$0xff]   ;;  %v2391_v57 = vld [vmem:[%s3472_s3 + $0x620] ss:$28 sps:$4 sm:$0xff]   ;;  %v2399_v59 = vld [vmem:[%s3472_s3 + $0x5ec] ss:$28 sps:$4 sm:$0xff]  }
  0x15   :  { %v2394_v60 = vld [vmem:[%s3472_s3 + $0x268] ss:$28 sps:$4 sm:$0xff]   ;;  %v2402_v62 = vld [vmem:[%s3472_s3 + $0x234] ss:$28 sps:$4 sm:$0xff]   ;;  %v2408_v2 = vld [vmem:[%s3472_s3 + $0x1fc] ss:$28 sps:$4 sm:$0xff]  }
  0x16   :  { %v2397_v61 = vld [vmem:[%s3472_s3 + $0x5e8] ss:$28 sps:$4 sm:$0xff]   ;;  %v2405_v63 = vld [vmem:[%s3472_s3 + $0x5b4] ss:$28 sps:$4 sm:$0xff]   ;;  %v2411_v3 = vld [vmem:[%s3472_s3 + $0x57c] ss:$28 sps:$4 sm:$0xff]  }
  0x17   :  { %1638 = vmatpush1.bf16.msra.mxu0 %v2340_v24  ;;  %1679 = vmatpush1.bf16.msra.mxu1 %v2343_v25  ;;  %v2400_v0 = vld [vmem:[%s3472_s3 + $0x230] ss:$28 sps:$4 sm:$0xff]   ;;  %v2406_v4 = vld [vmem:[%s3472_s3 + $0x1f8] ss:$28 sps:$4 sm:$0xff]   ;;  %v2414_v6 = vld [vmem:[%s3472_s3 + $0x1c4] ss:$28 sps:$4 sm:$0xff]  }
  0x18   :  { %1639 = vmatprep.subr.bf16.mxu0 %v2348_v26  ;;  %1680 = vmatprep.subr.bf16.mxu1 %v2351_v27  ;;  %v2403_v1 = vld [vmem:[%s3472_s3 + $0x5b0] ss:$28 sps:$4 sm:$0xff]   ;;  %v2409_v5 = vld [vmem:[%s3472_s3 + $0x578] ss:$28 sps:$4 sm:$0xff]   ;;  %v2417_v7 = vld [vmem:[%s3472_s3 + $0x544] ss:$28 sps:$4 sm:$0xff]  }
  0x19   :  { %v2412_v8 = vld [vmem:[%s3472_s3 + $0x1c0] ss:$28 sps:$4 sm:$0xff]   ;;  %v2420_v10 = vld [vmem:[%s3472_s3 + $0x194] ss:$28 sps:$4 sm:$0xff]   ;;  %v2920_v13 = vshrl.u32 %v32_v12, 7 }
  0x1a   :  { %v2415_v9 = vld [vmem:[%s3472_s3 + $0x540] ss:$28 sps:$4 sm:$0xff]   ;;  %v2423_v11 = vld [vmem:[%s3472_s3 + $0x514] ss:$28 sps:$4 sm:$0xff]  }
  0x1b   :  { %1640 = vmatpush1.bf16.msra.mxu0 %v2346_v28  ;;  %1681 = vmatpush1.bf16.msra.mxu1 %v2349_v29  ;;  %v34_v14 = vsub.s32 0, %v2920_v13  ;;  %v42_v15 = vsub.s32 2, %v2920_v13  ;;  %v30_v16 = vld [vmem:[%s3473_s2] sm:$0xf]  ;;  %v38_v17 = vsub.s32 1, %v2920_v13  ;;  %v46_v18 = vsub.s32 3, %v2920_v13 }
  0x1c   :  { %1641 = vmatprep.subr.bf16.mxu0 %v2354_v30  ;;  %1682 = vmatprep.subr.bf16.mxu1 %v2357_v31  ;;  %v2469_v12 = vld [vmem:[%s3472_s3 + $0x6d0] ss:$28 sps:$4 sm:$0xff]  }
  0x1d   :  { %v35_v19 = vrot.slane %v30_v16, %v34_v14  ;;  %v43_v20 = vrot.slane %v30_v16, %v42_v15  ;;  %v39_v21 = vrot.slane %v30_v16, %v38_v17  ;;  %v47_v22 = vrot.slane %v30_v16, %v46_v18  ;;  %v2474_v16 = vld [vmem:[%s3472_s3 + $0x31c] ss:$28 sps:$4 sm:$0xff]  }
  0x1f   :  { %1642 = vmatpush1.bf16.msra.mxu0 %v2352_v32  ;;  %1683 = vmatpush1.bf16.msra.mxu1 %v2355_v33 }
  0x20   :  { %1643 = vmatprep.subr.bf16.mxu0 %v2360_v34  ;;  %1684 = vmatprep.subr.bf16.mxu1 %v2363_v35 }
  0x23   :  { %1644 = vmatpush1.bf16.msra.mxu0 %v2358_v36  ;;  %1685 = vmatpush1.bf16.msra.mxu1 %v2361_v37 }
  0x24   :  { %1645 = vmatprep.subr.bf16.mxu0 %v2366_v38  ;;  %1686 = vmatprep.subr.bf16.mxu1 %v2369_v39 }
  0x27   :  { %1646 = vmatpush1.bf16.msra.mxu0 %v2364_v40  ;;  %1687 = vmatpush1.bf16.msra.mxu1 %v2367_v41  ;;  %v2418_v41 = vld [vmem:[%s3472_s3 + $0x190] ss:$28 sps:$4 sm:$0xff]  }
  0x28   :  { %1647 = vmatprep.subr.bf16.mxu0 %v2372_v42  ;;  %1688 = vmatprep.subr.bf16.mxu1 %v2375_v43 }
  0x2b   :  { %1648 = vmatpush2.bf16.msra.mxu0 %v2370_v44  ;;  %1689 = vmatpush2.bf16.msra.mxu1 %v2373_v45  ;;  %v2421_v44 = vld [vmem:[%s3472_s3 + $0x510] ss:$28 sps:$4 sm:$0xff]   ;;  %v2426_v45 = vld [vmem:[%s3472_s3 + $0x15c] ss:$28 sps:$4 sm:$0xff]  }
  0x2c   :  { %1649 = vmatprep.subr.bf16.mxu0 %v2378_v46  ;;  %1690 = vmatprep.subr.bf16.mxu1 %v2381_v47  ;;  %v2429_v46 = vld [vmem:[%s3472_s3 + $0x4dc] ss:$28 sps:$4 sm:$0xff]  }
  0x2d   :  { %v2424_v47 = vld [vmem:[%s3472_s3 + $0x158] ss:$28 sps:$4 sm:$0xff]  }
  0x2f   :  { %1650 = vmatpush2.bf16.msra.mxu0 %v2376_v48  ;;  %1691 = vmatpush2.bf16.msra.mxu1 %v2379_v49  ;;  %v2427_v48 = vld [vmem:[%s3472_s3 + $0x4d8] ss:$28 sps:$4 sm:$0xff]   ;;  %v2432_v49 = vld [vmem:[%s3472_s3 + $0x124] ss:$28 sps:$4 sm:$0xff]  }
  0x30   :  { %1651 = vmatprep.subr.bf16.mxu0 %v2384_v50  ;;  %1692 = vmatprep.subr.bf16.mxu1 %v2387_v51  ;;  %v2435_v50 = vld [vmem:[%s3472_s3 + $0x4a4] ss:$28 sps:$4 sm:$0xff]  }
  0x31   :  { %v2430_v51 = vld [vmem:[%s3472_s3 + $0x120] ss:$28 sps:$4 sm:$0xff]  }
  0x33   :  { %1652 = vmatpush2.bf16.msra.mxu0 %v2382_v52  ;;  %1693 = vmatpush2.bf16.msra.mxu1 %v2385_v53  ;;  %v2433_v52 = vld [vmem:[%s3472_s3 + $0x4a0] ss:$28 sps:$4 sm:$0xff]   ;;  %v2438_v53 = vld [vmem:[%s3472_s3 + $0xec] ss:$28 sps:$4 sm:$0xff]  }
  0x34   :  { %1653 = vmatprep.subr.bf16.mxu0 %v2390_v54  ;;  %1694 = vmatprep.subr.bf16.mxu1 %v2393_v55  ;;  %v2441_v54 = vld [vmem:[%s3472_s3 + $0x46c] ss:$28 sps:$4 sm:$0xff]  }
  0x35   :  { %v2436_v55 = vld [vmem:[%s3472_s3 + $0xe8] ss:$28 sps:$4 sm:$0xff]  }
  0x37   :  { %1654 = vmatpush2.bf16.msra.mxu0 %v2388_v56  ;;  %1695 = vmatpush2.bf16.msra.mxu1 %v2391_v57  ;;  %v2439_v56 = vld [vmem:[%s3472_s3 + $0x468] ss:$28 sps:$4 sm:$0xff]   ;;  %v2444_v57 = vld [vmem:[%s3472_s3 + $0xb4] ss:$28 sps:$4 sm:$0xff]  }
  0x38   :  { %1655 = vmatprep.subr.bf16.mxu0 %v2396_v58  ;;  %1696 = vmatprep.subr.bf16.mxu1 %v2399_v59  ;;  %v2447_v58 = vld [vmem:[%s3472_s3 + $0x434] ss:$28 sps:$4 sm:$0xff]  }
  0x39   :  { %v2442_v59 = vld [vmem:[%s3472_s3 + $0xb0] ss:$28 sps:$4 sm:$0xff]  }
  0x3b   :  { %1656 = vmatpush2.bf16.msra.mxu0 %v2394_v60  ;;  %1697 = vmatpush2.bf16.msra.mxu1 %v2397_v61  ;;  %v2445_v60 = vld [vmem:[%s3472_s3 + $0x430] ss:$28 sps:$4 sm:$0xff]   ;;  %v2450_v61 = vld [vmem:[%s3472_s3 + $0x7c] ss:$28 sps:$4 sm:$0xff]  }
  0x3c   :  { %1657 = vmatprep.subr.bf16.mxu0 %v2402_v62  ;;  %1698 = vmatprep.subr.bf16.mxu1 %v2405_v63  ;;  %v2453_v62 = vld [vmem:[%s3472_s3 + $0x3fc] ss:$28 sps:$4 sm:$0xff]  }
  0x3d   :  { %v2448_v63 = vld [vmem:[%s3472_s3 + $0x78] ss:$28 sps:$4 sm:$0xff]  }
  0x3f   :  { %1658 = vmatpush2.bf16.msra.mxu0 %v2400_v0  ;;  %1699 = vmatpush2.bf16.msra.mxu1 %v2403_v1  ;;  %v2451_v0 = vld [vmem:[%s3472_s3 + $0x3f8] ss:$28 sps:$4 sm:$0xff]   ;;  %v2456_v1 = vld [vmem:[%s3472_s3 + $0x44] ss:$28 sps:$4 sm:$0xff]  }
  0x40   :  { %1659 = vmatprep.subr.bf16.mxu0 %v2408_v2  ;;  %1700 = vmatprep.subr.bf16.mxu1 %v2411_v3  ;;  %v2459_v2 = vld [vmem:[%s3472_s3 + $0x3c4] ss:$28 sps:$4 sm:$0xff]  }
  0x41   :  { %v2454_v3 = vld [vmem:[%s3472_s3 + $0x40] ss:$28 sps:$4 sm:$0xff]  }
  0x43   :  { %1660 = vmatpush2.bf16.msra.mxu0 %v2406_v4  ;;  %1701 = vmatpush2.bf16.msra.mxu1 %v2409_v5  ;;  %v2457_v4 = vld [vmem:[%s3472_s3 + $0x3c0] ss:$28 sps:$4 sm:$0xff]   ;;  %v2462_v5 = vld [vmem:[%s3472_s3 + $0xc] ss:$28 sps:$4 sm:$0xff]  }
  0x44   :  { %1661 = vmatprep.subr.bf16.mxu0 %v2414_v6  ;;  %1702 = vmatprep.subr.bf16.mxu1 %v2417_v7  ;;  %v2465_v6 = vld [vmem:[%s3472_s3 + $0x38c] ss:$28 sps:$4 sm:$0xff]  }
  0x45   :  { %v2460_v7 = vld [vmem:[%s3472_s3 + $0x8] ss:$28 sps:$4 sm:$0xff]  }
  0x47   :  { %1662 = vmatpush2.bf16.msra.mxu0 %v2412_v8  ;;  %1703 = vmatpush2.bf16.msra.mxu1 %v2415_v9  ;;  %v2463_v8 = vld [vmem:[%s3472_s3 + $0x388] ss:$28 sps:$4 sm:$0xff]   ;;  %v2468_v9 = vld [vmem:[%s3472_s3 + $0x354] ss:$28 sps:$4 sm:$0xff]  }
  0x48   :  { %1713 = vmatprep.subr.bf16.mxu0 %v2420_v10  ;;  %1754 = vmatprep.subr.bf16.mxu1 %v2423_v11  ;;  %v2471_v10 = vld [vmem:[%s3472_s3 + $0x6d4] ss:$28 sps:$4 sm:$0xff]  }
  0x49   :  { %v2466_v11 = vld [vmem:[%s3472_s3 + $0x350] ss:$28 sps:$4 sm:$0xff]  }
  0xca   :  { %v130_v23 = vpop.f32.mrf.mxu0  ;;  %v171_v24 = vpop.f32.mrf.mxu1 }
  0xcb   :  { %v131_v25 = vadd.f32 %v130_v23, %v35_v19  ;;  %v172_v26 = vadd.f32 %v171_v24, %v43_v20  ;;  %v2477_v19 = vld [vmem:[%s3472_s3 + $0x69c] ss:$28 sps:$4 sm:$0xff]   ;;  %v2483_v23 = vld [vmem:[%s3472_s3 + $0x664] ss:$28 sps:$4 sm:$0xff]  }
  0xcc   :  { %v132_v27 = vpop.f32.mrf.mxu0  ;;  %v173_v28 = vpop.f32.mrf.mxu1  ;;  %v2472_v20 = vld [vmem:[%s3472_s3 + $0x318] ss:$28 sps:$4 sm:$0xff]   ;;  %v2478_v24 = vld [vmem:[%s3472_s3 + $0x2e0] ss:$28 sps:$4 sm:$0xff]  }
  0xcd   :  { %2642 = vtanh.f32 %v131_v25  ;;  %v133_v29 = vadd.f32 %v132_v27, %v39_v21  ;;  %v174_v30 = vadd.f32 %v173_v28, %v47_v22  ;;  %v2475_v21 = vld [vmem:[%s3472_s3 + $0x698] ss:$28 sps:$4 sm:$0xff]   ;;  %v2480_v22 = vld [vmem:[%s3472_s3 + $0x2e4] ss:$28 sps:$4 sm:$0xff]   ;;  %v2489_v27 = vld [vmem:[%s3472_s3 + $0x62c] ss:$28 sps:$4 sm:$0xff]  }
  0xce   :  { %2644 = vtanh.f32 %v172_v26  ;;  %v134_v31 = vpop.f32.mrf.mxu0  ;;  %v175_v32 = vpop.f32.mrf.mxu1  ;;  %v2481_v25 = vld [vmem:[%s3472_s3 + $0x660] ss:$28 sps:$4 sm:$0xff]   ;;  %v2486_v26 = vld [vmem:[%s3472_s3 + $0x2ac] ss:$28 sps:$4 sm:$0xff]  }
  0xcf   :  { %2646 = vtanh.f32 %v133_v29  ;;  %v2484_v28 = vld [vmem:[%s3472_s3 + $0x2a8] ss:$28 sps:$4 sm:$0xff]   ;;  %v2495_v31 = vld [vmem:[%s3472_s3 + $0x5f4] ss:$28 sps:$4 sm:$0xff]  }
  0xd0   :  { %2648 = vtanh.f32 %v174_v30  ;;  %v135_v33 = vpop.f32.mrf.mxu0  ;;  %v176_v34 = vpop.f32.mrf.mxu1  ;;  %v2487_v29 = vld [vmem:[%s3472_s3 + $0x628] ss:$28 sps:$4 sm:$0xff]   ;;  %v2492_v30 = vld [vmem:[%s3472_s3 + $0x274] ss:$28 sps:$4 sm:$0xff]  }
  0xd1   :  { %v2490_v32 = vld [vmem:[%s3472_s3 + $0x270] ss:$28 sps:$4 sm:$0xff]   ;;  %v2498_v34 = vld [vmem:[%s3472_s3 + $0x23c] ss:$28 sps:$4 sm:$0xff]  }
  0xd2   :  { %v2493_v33 = vld [vmem:[%s3472_s3 + $0x5f0] ss:$28 sps:$4 sm:$0xff]  }
  0xda   :  { %v2643_v35 = vpop.eup %2642 }
  0xdb   :  { %v2645_v36 = vpop.eup %2644  ;;  %v2944_v42 = vpack.c.bf16 %v2643_v35, %v2643_v35  ;;  %v2501_v35 = vld [vmem:[%s3472_s3 + $0x5bc] ss:$28 sps:$4 sm:$0xff]  }
  0xdc   :  { %v2647_v37 = vpop.eup %2646  ;;  %v2937_v39 = vpack.c.bf16 %v2645_v36, %v2645_v36  ;;  %v2496_v36 = vld [vmem:[%s3472_s3 + $0x238] ss:$28 sps:$4 sm:$0xff]  }
  0xdd   :  { %v2649_v38 = vpop.eup %2648  ;;  %v2939_v40 = vpack.c.bf16 %v2647_v37, %v2647_v37  ;;  %v2499_v37 = vld [vmem:[%s3472_s3 + $0x5b8] ss:$28 sps:$4 sm:$0xff]  }
  0xde   :  { %v2946_v43 = vpack.c.bf16 %v2649_v38, %v2649_v38  ;;  %v2504_v38 = vld [vmem:[%s3472_s3 + $0x204] ss:$28 sps:$4 sm:$0xff]  }
  0xdf   :  { %1663 = vmatprep.mubr.bf16.mxu0 %v2939_v40 }
  0xe0   :  { %1704 = vmatprep.mubr.bf16.mxu1 %v2946_v43  ;;  %1664 = vmatmul.mubr.bf16.vlgmr.msra.gmra.mxu0 %v2944_v42 }
  0xe1   :  { %1705 = vmatmul.mubr.bf16.vlgmr.msra.gmra.mxu1 %v2937_v39  ;;  %1714 = vmatpush1.bf16.msra.mxu0 %v2418_v41  ;;  %v2507_v41 = vld [vmem:[%s3472_s3 + $0x584] ss:$28 sps:$4 sm:$0xff]  }
  0xe2   :  { %1755 = vmatpush1.bf16.msra.mxu1 %v2421_v44  ;;  %1745 = vmatprep.mubr.bf16.mxu0 %v2939_v40  ;;  %v2502_v44 = vld [vmem:[%s3472_s3 + $0x200] ss:$28 sps:$4 sm:$0xff]  }
  0xe3   :  { %1786 = vmatprep.mubr.bf16.mxu1 %v2946_v43  ;;  %1715 = vmatprep.subr.bf16.mxu0 %v2426_v45  ;;  %v2505_v45 = vld [vmem:[%s3472_s3 + $0x580] ss:$28 sps:$4 sm:$0xff]  }
  0xe4   :  { %1756 = vmatprep.subr.bf16.mxu1 %v2429_v46  ;;  %v2510_v46 = vld [vmem:[%s3472_s3 + $0x1cc] ss:$28 sps:$4 sm:$0xff]  }
  0xe5   :  { %1716 = vmatpush1.bf16.msra.mxu0 %v2424_v47  ;;  %v2513_v47 = vld [vmem:[%s3472_s3 + $0x54c] ss:$28 sps:$4 sm:$0xff]  }
  0xe6   :  { %1757 = vmatpush1.bf16.msra.mxu1 %v2427_v48  ;;  %1717 = vmatprep.subr.bf16.mxu0 %v2432_v49  ;;  %v2508_v48 = vld [vmem:[%s3472_s3 + $0x1c8] ss:$28 sps:$4 sm:$0xff]  }
  0xe7   :  { %1758 = vmatprep.subr.bf16.mxu1 %v2435_v50  ;;  %v2511_v49 = vld [vmem:[%s3472_s3 + $0x548] ss:$28 sps:$4 sm:$0xff]   ;;  %v2516_v50 = vld [vmem:[%s3472_s3 + $0x19c] ss:$28 sps:$4 sm:$0xff]  }
  0xe9   :  { %1718 = vmatpush1.bf16.msra.mxu0 %v2430_v51  ;;  %v2519_v51 = vld [vmem:[%s3472_s3 + $0x51c] ss:$28 sps:$4 sm:$0xff]  }
  0xea   :  { %1759 = vmatpush1.bf16.msra.mxu1 %v2433_v52  ;;  %1719 = vmatprep.subr.bf16.mxu0 %v2438_v53  ;;  %v2514_v52 = vld [vmem:[%s3472_s3 + $0x198] ss:$28 sps:$4 sm:$0xff]  }
  0xeb   :  { %1760 = vmatprep.subr.bf16.mxu1 %v2441_v54  ;;  %v2517_v53 = vld [vmem:[%s3472_s3 + $0x518] ss:$28 sps:$4 sm:$0xff]   ;;  %v2522_v54 = vld [vmem:[%s3472_s3 + $0x164] ss:$28 sps:$4 sm:$0xff]  }
  0xed   :  { %1720 = vmatpush1.bf16.msra.mxu0 %v2436_v55  ;;  %v2525_v55 = vld [vmem:[%s3472_s3 + $0x4e4] ss:$28 sps:$4 sm:$0xff]  }
  0xee   :  { %1761 = vmatpush1.bf16.msra.mxu1 %v2439_v56  ;;  %1721 = vmatprep.subr.bf16.mxu0 %v2444_v57  ;;  %v2520_v56 = vld [vmem:[%s3472_s3 + $0x160] ss:$28 sps:$4 sm:$0xff]  }
  0xef   :  { %1762 = vmatprep.subr.bf16.mxu1 %v2447_v58  ;;  %v2523_v57 = vld [vmem:[%s3472_s3 + $0x4e0] ss:$28 sps:$4 sm:$0xff]   ;;  %v2528_v58 = vld [vmem:[%s3472_s3 + $0x12c] ss:$28 sps:$4 sm:$0xff]  }
  0xf1   :  { %1722 = vmatpush1.bf16.msra.mxu0 %v2442_v59  ;;  %v2531_v59 = vld [vmem:[%s3472_s3 + $0x4ac] ss:$28 sps:$4 sm:$0xff]  }
  0xf2   :  { %1763 = vmatpush1.bf16.msra.mxu1 %v2445_v60  ;;  %1723 = vmatprep.subr.bf16.mxu0 %v2450_v61  ;;  %v2526_v60 = vld [vmem:[%s3472_s3 + $0x128] ss:$28 sps:$4 sm:$0xff]  }
  0xf3   :  { %1764 = vmatprep.subr.bf16.mxu1 %v2453_v62  ;;  %v2529_v61 = vld [vmem:[%s3472_s3 + $0x4a8] ss:$28 sps:$4 sm:$0xff]   ;;  %v2534_v62 = vld [vmem:[%s3472_s3 + $0xf4] ss:$28 sps:$4 sm:$0xff]  }
  0xf5   :  { %1724 = vmatpush1.bf16.msra.mxu0 %v2448_v63  ;;  %v2537_v63 = vld [vmem:[%s3472_s3 + $0x474] ss:$28 sps:$4 sm:$0xff]  }
  0xf6   :  { %1765 = vmatpush1.bf16.msra.mxu1 %v2451_v0  ;;  %1725 = vmatprep.subr.bf16.mxu0 %v2456_v1  ;;  %v2532_v0 = vld [vmem:[%s3472_s3 + $0xf0] ss:$28 sps:$4 sm:$0xff]  }
  0xf7   :  { %1766 = vmatprep.subr.bf16.mxu1 %v2459_v2  ;;  %v2535_v1 = vld [vmem:[%s3472_s3 + $0x470] ss:$28 sps:$4 sm:$0xff]   ;;  %v2540_v2 = vld [vmem:[%s3472_s3 + $0xbc] ss:$28 sps:$4 sm:$0xff]  }
  0xf9   :  { %1726 = vmatpush1.bf16.msra.mxu0 %v2454_v3  ;;  %v2543_v3 = vld [vmem:[%s3472_s3 + $0x43c] ss:$28 sps:$4 sm:$0xff]  }
  0xfa   :  { %1767 = vmatpush1.bf16.msra.mxu1 %v2457_v4  ;;  %1727 = vmatprep.subr.bf16.mxu0 %v2462_v5  ;;  %v2538_v4 = vld [vmem:[%s3472_s3 + $0xb8] ss:$28 sps:$4 sm:$0xff]  }
  0xfb   :  { %1768 = vmatprep.subr.bf16.mxu1 %v2465_v6  ;;  %v2541_v5 = vld [vmem:[%s3472_s3 + $0x438] ss:$28 sps:$4 sm:$0xff]   ;;  %v2546_v6 = vld [vmem:[%s3472_s3 + $0x84] ss:$28 sps:$4 sm:$0xff]  }
  0xfd   :  { %1728 = vmatpush1.bf16.msra.mxu0 %v2460_v7  ;;  %v2549_v7 = vld [vmem:[%s3472_s3 + $0x404] ss:$28 sps:$4 sm:$0xff]  }
  0xfe   :  { %1769 = vmatpush1.bf16.msra.mxu1 %v2463_v8  ;;  %1729 = vmatprep.subr.bf16.mxu0 %v2468_v9  ;;  %v2544_v8 = vld [vmem:[%s3472_s3 + $0x80] ss:$28 sps:$4 sm:$0xff]  }
  0xff   :  { %1770 = vmatprep.subr.bf16.mxu1 %v2471_v10  ;;  %v2547_v9 = vld [vmem:[%s3472_s3 + $0x400] ss:$28 sps:$4 sm:$0xff]   ;;  %v2552_v10 = vld [vmem:[%s3472_s3 + $0x4c] ss:$28 sps:$4 sm:$0xff]  }
 0x101   :  { %1730 = vmatpush2.bf16.msra.mxu0 %v2466_v11  ;;  %v2555_v11 = vld [vmem:[%s3472_s3 + $0x3cc] ss:$28 sps:$4 sm:$0xff]  }
 0x102   :  { %1771 = vmatpush2.bf16.msra.mxu1 %v2469_v12  ;;  %1731 = vmatprep.subr.bf16.mxu0 %v2474_v16  ;;  %v2550_v12 = vld [vmem:[%s3472_s3 + $0x48] ss:$28 sps:$4 sm:$0xff]  }
 0x103   :  { %1772 = vmatprep.subr.bf16.mxu1 %v2477_v19  ;;  %v2553_v16 = vld [vmem:[%s3472_s3 + $0x3c8] ss:$28 sps:$4 sm:$0xff]   ;;  %v2558_v19 = vld [vmem:[%s3472_s3 + $0x14] ss:$28 sps:$4 sm:$0xff]  }
 0x105   :  { %1732 = vmatpush2.bf16.msra.mxu0 %v2472_v20  ;;  %v2561_v20 = vld [vmem:[%s3472_s3 + $0x394] ss:$28 sps:$4 sm:$0xff]  }
 0x106   :  { %1773 = vmatpush2.bf16.msra.mxu1 %v2475_v21  ;;  %1733 = vmatprep.subr.bf16.mxu0 %v2480_v22  ;;  %v2556_v21 = vld [vmem:[%s3472_s3 + $0x10] ss:$28 sps:$4 sm:$0xff]  }
 0x107   :  { %1774 = vmatprep.subr.bf16.mxu1 %v2483_v23  ;;  %v2559_v22 = vld [vmem:[%s3472_s3 + $0x390] ss:$28 sps:$4 sm:$0xff]   ;;  %v2564_v23 = vld [vmem:[%s3472_s3 + $0x35c] ss:$28 sps:$4 sm:$0xff]  }
 0x109   :  { %1734 = vmatpush2.bf16.msra.mxu0 %v2478_v24  ;;  %v2567_v24 = vld [vmem:[%s3472_s3 + $0x6dc] ss:$28 sps:$4 sm:$0xff]  }
 0x10a   :  { %1775 = vmatpush2.bf16.msra.mxu1 %v2481_v25  ;;  %1735 = vmatprep.subr.bf16.mxu0 %v2486_v26  ;;  %v2562_v25 = vld [vmem:[%s3472_s3 + $0x358] ss:$28 sps:$4 sm:$0xff]  }
 0x10b   :  { %1776 = vmatprep.subr.bf16.mxu1 %v2489_v27  ;;  %v2565_v26 = vld [vmem:[%s3472_s3 + $0x6d8] ss:$28 sps:$4 sm:$0xff]   ;;  %v2570_v27 = vld [vmem:[%s3472_s3 + $0x324] ss:$28 sps:$4 sm:$0xff]  }
 0x10d   :  { %1736 = vmatpush2.bf16.msra.mxu0 %v2484_v28  ;;  %v2573_v28 = vld [vmem:[%s3472_s3 + $0x6a4] ss:$28 sps:$4 sm:$0xff]  }
 0x10e   :  { %1777 = vmatpush2.bf16.msra.mxu1 %v2487_v29  ;;  %1737 = vmatprep.subr.bf16.mxu0 %v2492_v30  ;;  %v2568_v29 = vld [vmem:[%s3472_s3 + $0x320] ss:$28 sps:$4 sm:$0xff]  }
 0x10f   :  { %1778 = vmatprep.subr.bf16.mxu1 %v2495_v31  ;;  %v2571_v30 = vld [vmem:[%s3472_s3 + $0x6a0] ss:$28 sps:$4 sm:$0xff]   ;;  %v2576_v31 = vld [vmem:[%s3472_s3 + $0x2ec] ss:$28 sps:$4 sm:$0xff]  }
 0x111   :  { %1738 = vmatpush2.bf16.msra.mxu0 %v2490_v32  ;;  %v2579_v32 = vld [vmem:[%s3472_s3 + $0x66c] ss:$28 sps:$4 sm:$0xff]  }
 0x112   :  { %1779 = vmatpush2.bf16.msra.mxu1 %v2493_v33  ;;  %1739 = vmatprep.subr.bf16.mxu0 %v2498_v34  ;;  %v2574_v33 = vld [vmem:[%s3472_s3 + $0x2e8] ss:$28 sps:$4 sm:$0xff]  }
 0x113   :  { %1780 = vmatprep.subr.bf16.mxu1 %v2501_v35  ;;  %v2577_v34 = vld [vmem:[%s3472_s3 + $0x668] ss:$28 sps:$4 sm:$0xff]   ;;  %v2582_v35 = vld [vmem:[%s3472_s3 + $0x2b4] ss:$28 sps:$4 sm:$0xff]  }
 0x115   :  { %1740 = vmatpush2.bf16.msra.mxu0 %v2496_v36  ;;  %v2585_v36 = vld [vmem:[%s3472_s3 + $0x634] ss:$28 sps:$4 sm:$0xff]  }
 0x116   :  { %1781 = vmatpush2.bf16.msra.mxu1 %v2499_v37  ;;  %1741 = vmatprep.subr.bf16.mxu0 %v2504_v38  ;;  %v2580_v37 = vld [vmem:[%s3472_s3 + $0x2b0] ss:$28 sps:$4 sm:$0xff]  }
 0x117   :  { %1782 = vmatprep.subr.bf16.mxu1 %v2507_v41  ;;  %v2583_v38 = vld [vmem:[%s3472_s3 + $0x630] ss:$28 sps:$4 sm:$0xff]   ;;  %v2588_v41 = vld [vmem:[%s3472_s3 + $0x27c] ss:$28 sps:$4 sm:$0xff]  }
 0x119   :  { %1742 = vmatpush2.bf16.msra.mxu0 %v2502_v44  ;;  %v2591_v44 = vld [vmem:[%s3472_s3 + $0x5fc] ss:$28 sps:$4 sm:$0xff]  }
 0x11a   :  { %1783 = vmatpush2.bf16.msra.mxu1 %v2505_v45  ;;  %1743 = vmatprep.subr.bf16.mxu0 %v2510_v46  ;;  %v2586_v45 = vld [vmem:[%s3472_s3 + $0x278] ss:$28 sps:$4 sm:$0xff]  }
 0x11b   :  { %1784 = vmatprep.subr.bf16.mxu1 %v2513_v47  ;;  %v2589_v46 = vld [vmem:[%s3472_s3 + $0x5f8] ss:$28 sps:$4 sm:$0xff]   ;;  %v2594_v47 = vld [vmem:[%s3472_s3 + $0x244] ss:$28 sps:$4 sm:$0xff]  }
 0x11d   :  { %1744 = vmatpush2.bf16.msra.mxu0 %v2508_v48  ;;  %v2597_v48 = vld [vmem:[%s3472_s3 + $0x5c4] ss:$28 sps:$4 sm:$0xff]  }
 0x11e   :  { %1785 = vmatpush2.bf16.msra.mxu1 %v2511_v49  ;;  %1795 = vmatprep.subr.bf16.mxu0 %v2516_v50  ;;  %v2592_v49 = vld [vmem:[%s3472_s3 + $0x240] ss:$28 sps:$4 sm:$0xff]  }
 0x11f   :  { %1836 = vmatprep.subr.bf16.mxu1 %v2519_v51  ;;  %v2595_v50 = vld [vmem:[%s3472_s3 + $0x5c0] ss:$28 sps:$4 sm:$0xff]   ;;  %v2600_v51 = vld [vmem:[%s3472_s3 + $0x20c] ss:$28 sps:$4 sm:$0xff]  }
 0x120   :  { %1746 = vmatmul.mubr.bf16.vlgmr.msra.gmra.mxu0 %v2944_v42 }
 0x121   :  { %1787 = vmatmul.mubr.bf16.vlgmr.msra.gmra.mxu1 %v2937_v39  ;;  %1796 = vmatpush1.bf16.msra.mxu0 %v2514_v52  ;;  %v2603_v52 = vld [vmem:[%s3472_s3 + $0x58c] ss:$28 sps:$4 sm:$0xff]  }
 0x122   :  { %1827 = vmatprep.mubr.bf16.mxu0 %v2939_v40  ;;  %1837 = vmatpush1.bf16.msra.mxu1 %v2517_v53  ;;  %v2598_v53 = vld [vmem:[%s3472_s3 + $0x208] ss:$28 sps:$4 sm:$0xff]  }
 0x123   :  { %1868 = vmatprep.mubr.bf16.mxu1 %v2946_v43  ;;  %1797 = vmatprep.subr.bf16.mxu0 %v2522_v54  ;;  %v2601_v54 = vld [vmem:[%s3472_s3 + $0x588] ss:$28 sps:$4 sm:$0xff]  }
 0x124   :  { %1838 = vmatprep.subr.bf16.mxu1 %v2525_v55  ;;  %v2606_v55 = vld [vmem:[%s3472_s3 + $0x1d4] ss:$28 sps:$4 sm:$0xff]  }
 0x125   :  { %1798 = vmatpush1.bf16.msra.mxu0 %v2520_v56  ;;  %v2609_v56 = vld [vmem:[%s3472_s3 + $0x554] ss:$28 sps:$4 sm:$0xff]  }
 0x126   :  { %1839 = vmatpush1.bf16.msra.mxu1 %v2523_v57  ;;  %1799 = vmatprep.subr.bf16.mxu0 %v2528_v58  ;;  %v2604_v57 = vld [vmem:[%s3472_s3 + $0x1d0] ss:$28 sps:$4 sm:$0xff]  }
 0x127   :  { %1840 = vmatprep.subr.bf16.mxu1 %v2531_v59  ;;  %v2607_v58 = vld [vmem:[%s3472_s3 + $0x550] ss:$28 sps:$4 sm:$0xff]   ;;  %v2610_v59 = vld [vmem:[%s3472_s3 + $0x360] ss:$28 sps:$4 sm:$0xff]  }
 0x129   :  { %1800 = vmatpush1.bf16.msra.mxu0 %v2526_v60  ;;  %v2611_v60 = vld [vmem:[%s3472_s3 + $0x6e0] ss:$28 sps:$4 sm:$0xff]  }
 0x12a   :  { %1841 = vmatpush1.bf16.msra.mxu1 %v2529_v61  ;;  %1801 = vmatprep.subr.bf16.mxu0 %v2534_v62  ;;  %v2612_v61 = vld [vmem:[%s3472_s3 + $0x1a0] ss:$28 sps:$4 sm:$0xff]  }
 0x12b   :  { %1842 = vmatprep.subr.bf16.mxu1 %v2537_v63  ;;  %v2613_v62 = vld [vmem:[%s3472_s3 + $0x520] ss:$28 sps:$4 sm:$0xff]   ;;  %v2614_v63 = vld [vmem:[%s3472_s3 + $0x328] ss:$28 sps:$4 sm:$0xff]  }
 0x12d   :  { %1802 = vmatpush1.bf16.msra.mxu0 %v2532_v0  ;;  %v2615_v0 = vld [vmem:[%s3472_s3 + $0x6a8] ss:$28 sps:$4 sm:$0xff]  }
 0x12e   :  { %1843 = vmatpush1.bf16.msra.mxu1 %v2535_v1  ;;  %1803 = vmatprep.subr.bf16.mxu0 %v2540_v2  ;;  %v2616_v1 = vld [vmem:[%s3472_s3 + $0x168] ss:$28 sps:$4 sm:$0xff]  }
 0x12f   :  { %1844 = vmatprep.subr.bf16.mxu1 %v2543_v3  ;;  %v2617_v2 = vld [vmem:[%s3472_s3 + $0x4e8] ss:$28 sps:$4 sm:$0xff]   ;;  %v2618_v3 = vld [vmem:[%s3472_s3 + $0x2f0] ss:$28 sps:$4 sm:$0xff]  }
 0x131   :  { %1804 = vmatpush1.bf16.msra.mxu0 %v2538_v4  ;;  %v2619_v4 = vld [vmem:[%s3472_s3 + $0x670] ss:$28 sps:$4 sm:$0xff]  }
 0x132   :  { %1845 = vmatpush1.bf16.msra.mxu1 %v2541_v5  ;;  %1805 = vmatprep.subr.bf16.mxu0 %v2546_v6  ;;  %v2621_v5 = vld [vmem:[%s3472_s3 + $0x4b0] ss:$28 sps:$4 sm:$0xff]   ;;  %v2623_v6 = vld [vmem:[%s3472_s3 + $0x638] ss:$28 sps:$4 sm:$0xff]  }
 0x133   :  { %1846 = vmatprep.subr.bf16.mxu1 %v2549_v7  ;;  %v2624_v7 = vld [vmem:[%s3472_s3 + $0xf8] ss:$28 sps:$4 sm:$0xff]  }
 0x135   :  { %1806 = vmatpush1.bf16.msra.mxu0 %v2544_v8  ;;  %v2625_v8 = vld [vmem:[%s3472_s3 + $0x478] ss:$28 sps:$4 sm:$0xff]  }
 0x136   :  { %1847 = vmatpush1.bf16.msra.mxu1 %v2547_v9  ;;  %1807 = vmatprep.subr.bf16.mxu0 %v2552_v10  ;;  %v2626_v9 = vld [vmem:[%s3472_s3 + $0x280] ss:$28 sps:$4 sm:$0xff]  }
 0x137   :  { %1848 = vmatprep.subr.bf16.mxu1 %v2555_v11  ;;  %v2627_v10 = vld [vmem:[%s3472_s3 + $0x600] ss:$28 sps:$4 sm:$0xff]  }
 0x138   :  { %v2628_v11 = vld [vmem:[%s3472_s3 + $0xc0] ss:$28 sps:$4 sm:$0xff]  }
 0x139   :  { %1808 = vmatpush1.bf16.msra.mxu0 %v2550_v12  ;;  %v2629_v12 = vld [vmem:[%s3472_s3 + $0x440] ss:$28 sps:$4 sm:$0xff]  }
 0x13a   :  { %1849 = vmatpush1.bf16.msra.mxu1 %v2553_v16  ;;  %1809 = vmatprep.subr.bf16.mxu0 %v2558_v19  ;;  %v2630_v16 = vld [vmem:[%s3472_s3 + $0x248] ss:$28 sps:$4 sm:$0xff]  }
 0x13b   :  { %1850 = vmatprep.subr.bf16.mxu1 %v2561_v20  ;;  %v2631_v19 = vld [vmem:[%s3472_s3 + $0x5c8] ss:$28 sps:$4 sm:$0xff]  }
 0x13c   :  { %v2632_v20 = vld [vmem:[%s3472_s3 + $0x88] ss:$28 sps:$4 sm:$0xff]  }
 0x13d   :  { %1810 = vmatpush1.bf16.msra.mxu0 %v2556_v21  ;;  %v2633_v21 = vld [vmem:[%s3472_s3 + $0x408] ss:$28 sps:$4 sm:$0xff]  }
 0x13e   :  { %1851 = vmatpush1.bf16.msra.mxu1 %v2559_v22  ;;  %1811 = vmatprep.subr.bf16.mxu0 %v2564_v23  ;;  %v2634_v22 = vld [vmem:[%s3472_s3 + $0x210] ss:$28 sps:$4 sm:$0xff]  }
 0x13f   :  { %1852 = vmatprep.subr.bf16.mxu1 %v2567_v24  ;;  %v2635_v23 = vld [vmem:[%s3472_s3 + $0x590] ss:$28 sps:$4 sm:$0xff]  }
 0x140   :  { %v2636_v24 = vld [vmem:[%s3472_s3 + $0x50] ss:$28 sps:$4 sm:$0xff]  }
 0x141   :  { %1812 = vmatpush2.bf16.msra.mxu0 %v2562_v25  ;;  %v2637_v25 = vld [vmem:[%s3472_s3 + $0x3d0] ss:$28 sps:$4 sm:$0xff]  }
 0x142   :  { %1853 = vmatpush2.bf16.msra.mxu1 %v2565_v26  ;;  %1813 = vmatprep.subr.bf16.mxu0 %v2570_v27  ;;  %v2638_v26 = vld [vmem:[%s3472_s3 + $0x1d8] ss:$28 sps:$4 sm:$0xff]  }
 0x143   :  { %1854 = vmatprep.subr.bf16.mxu1 %v2573_v28  ;;  %v2639_v27 = vld [vmem:[%s3472_s3 + $0x558] ss:$28 sps:$4 sm:$0xff]  }
 0x144   :  { %v2640_v28 = vld [vmem:[%s3472_s3 + $0x18] ss:$28 sps:$4 sm:$0xff]  }
 0x145   :  { %1814 = vmatpush2.bf16.msra.mxu0 %v2568_v29  ;;  %v2641_v29 = vld [vmem:[%s3472_s3 + $0x398] ss:$28 sps:$4 sm:$0xff]  }
 0x146   :  { %1855 = vmatpush2.bf16.msra.mxu1 %v2571_v30  ;;  %1815 = vmatprep.subr.bf16.mxu0 %v2576_v31  ;;  %v3438_v30 = vld [vmem:[%s3474_s4] sm:$0x7f] }
 0x147   :  { %1856 = vmatprep.subr.bf16.mxu1 %v2579_v32  ;;  %v447_v31 = vrot.slane %v3438_v30, %v34_v14  ;;  %v451_v32 = vrot.slane %v3438_v30, %v38_v17 }
 0x149   :  { %1816 = vmatpush2.bf16.msra.mxu0 %v2574_v33 }
 0x14a   :  { %1857 = vmatpush2.bf16.msra.mxu1 %v2577_v34  ;;  %1817 = vmatprep.subr.bf16.mxu0 %v2582_v35 }
 0x14b   :  { %1858 = vmatprep.subr.bf16.mxu1 %v2585_v36 }
 0x14d   :  { %1818 = vmatpush2.bf16.msra.mxu0 %v2580_v37 }
 0x14e   :  { %1859 = vmatpush2.bf16.msra.mxu1 %v2583_v38  ;;  %1819 = vmatprep.subr.bf16.mxu0 %v2588_v41 }
 0x14f   :  { %1860 = vmatprep.subr.bf16.mxu1 %v2591_v44 }
 0x151   :  { %1820 = vmatpush2.bf16.msra.mxu0 %v2586_v45 }
 0x152   :  { %1861 = vmatpush2.bf16.msra.mxu1 %v2589_v46  ;;  %1821 = vmatprep.subr.bf16.mxu0 %v2594_v47 }
 0x153   :  { %1862 = vmatprep.subr.bf16.mxu1 %v2597_v48 }
 0x155   :  { %1822 = vmatpush2.bf16.msra.mxu0 %v2592_v49 }
 0x156   :  { %1863 = vmatpush2.bf16.msra.mxu1 %v2595_v50  ;;  %1823 = vmatprep.subr.bf16.mxu0 %v2600_v51 }
 0x157   :  { %1864 = vmatprep.subr.bf16.mxu1 %v2603_v52 }
 0x159   :  { %1824 = vmatpush2.bf16.msra.mxu0 %v2598_v53 }
 0x15a   :  { %1865 = vmatpush2.bf16.msra.mxu1 %v2601_v54  ;;  %1825 = vmatprep.subr.bf16.mxu0 %v2606_v55  ;;  %v455_v54 = vrot.slane %v3438_v30, %v42_v15  ;;  %v459_v55 = vrot.slane %v3438_v30, %v46_v18 }
 0x15b   :  { %1866 = vmatprep.subr.bf16.mxu1 %v2609_v56 }
 0x15d   :  { %1826 = vmatpush2.bf16.msra.mxu0 %v2604_v57 }
 0x15e   :  { %1867 = vmatpush2.bf16.msra.mxu1 %v2607_v58  ;;  %2265 = vmatprep.subr.bf16.mxu0 %v2610_v59 }
 0x15f   :  { %2287 = vmatprep.subr.bf16.mxu1 %v2611_v60 }
 0x160   :  { %1828 = vmatmul.mubr.bf16.vlgmr.msra.gmra.mxu0 %v2944_v42 }
 0x161   :  { %1869 = vmatmul.mubr.bf16.vlgmr.msra.gmra.mxu1 %v2937_v39  ;;  %2266 = vmatpush3.bf16.msra.mxu0 %v2612_v61 }
 0x162   :  { %1909 = vmatprep.mubr.bf16.mxu0 %v2939_v40  ;;  %2288 = vmatpush3.bf16.msra.mxu1 %v2613_v62  ;;  %v2620_v40 = vld [vmem:[%s3472_s3 + $0x130] ss:$28 sps:$4 sm:$0xff]  }
 0x163   :  { %1949 = vmatprep.mubr.bf16.mxu1 %v2946_v43  ;;  %2267 = vmatprep.subr.bf16.mxu0 %v2614_v63  ;;  %v2622_v43 = vld [vmem:[%s3472_s3 + $0x2b8] ss:$28 sps:$4 sm:$0xff]  }
 0x164   :  { %2289 = vmatprep.subr.bf16.mxu1 %v2615_v0 }
 0x165   :  { %2268 = vmatpush3.bf16.msra.mxu0 %v2616_v1 }
 0x166   :  { %2290 = vmatpush3.bf16.msra.mxu1 %v2617_v2  ;;  %2269 = vmatprep.subr.bf16.mxu0 %v2618_v3 }
 0x167   :  { %2291 = vmatprep.subr.bf16.mxu1 %v2619_v4 }
 0x169   :  { %2270 = vmatpush3.bf16.msra.mxu0 %v2620_v40 }
 0x16a   :  { %2292 = vmatpush3.bf16.msra.mxu1 %v2621_v5  ;;  %2271 = vmatprep.subr.bf16.mxu0 %v2622_v43 }
 0x16b   :  { %2293 = vmatprep.subr.bf16.mxu1 %v2623_v6 }
 0x16d   :  { %2272 = vmatpush3.bf16.msra.mxu0 %v2624_v7 }
 0x16e   :  { %2294 = vmatpush3.bf16.msra.mxu1 %v2625_v8  ;;  %2273 = vmatprep.subr.bf16.mxu0 %v2626_v9  ;;  %v462_v9 = vsub.s32 4, %v2920_v13 }
 0x16f   :  { %2295 = vmatprep.subr.bf16.mxu1 %v2627_v10  ;;  %v466_v10 = vsub.s32 5, %v2920_v13 }
 0x171   :  { %2274 = vmatpush3.bf16.msra.mxu0 %v2628_v11  ;;  %v463_v11 = vrot.slane %v3438_v30, %v462_v9 }
 0x172   :  { %2296 = vmatpush3.bf16.msra.mxu1 %v2629_v12  ;;  %2275 = vmatprep.subr.bf16.mxu0 %v2630_v16  ;;  %v467_v12 = vrot.slane %v3438_v30, %v466_v10 }
 0x173   :  { %2297 = vmatprep.subr.bf16.mxu1 %v2631_v19 }
 0x175   :  { %2276 = vmatpush3.bf16.msra.mxu0 %v2632_v20 }
 0x176   :  { %2298 = vmatpush3.bf16.msra.mxu1 %v2633_v21  ;;  %2277 = vmatprep.subr.bf16.mxu0 %v2634_v22 }
 0x177   :  { %2299 = vmatprep.subr.bf16.mxu1 %v2635_v23 }
 0x179   :  { %2278 = vmatpush3.bf16.msra.mxu0 %v2636_v24 }
 0x17a   :  { %2300 = vmatpush3.bf16.msra.mxu1 %v2637_v25  ;;  %2279 = vmatprep.subr.bf16.mxu0 %v2638_v26 }
 0x17b   :  { %2301 = vmatprep.subr.bf16.mxu1 %v2639_v27 }
 0x17d   :  { %2280 = vmatpush3.bf16.msra.mxu0 %v2640_v28 }
 0x17e   :  { %2302 = vmatpush3.bf16.msra.mxu1 %v2641_v29 }
 0x180   :  { %1910 = vmatmul.mubr.bf16.vlgmr.msra.gmra.mxu0 %v2944_v42 }
 0x181   :  { %1950 = vmatmul.mubr.bf16.vlgmr.msra.gmra.mxu1 %v2937_v39 }
 0x1a0   :  { %v1665_v33 = vpop.f32.mrf.mxu0 }
 0x1a1   :  { %v1666_v34 = vadd.f32 %v1665_v33, %v447_v31  ;;  %v1706_v35 = vpop.f32.mrf.mxu1 }
 0x1a2   :  { %v1667_v36 = vpop.f32.mrf.mxu0 }
 0x1a3   :  { %v1707_v42 = vadd.f32 %v1706_v35, %v1666_v34  ;;  %v1668_v37 = vadd.f32 %v1667_v36, %v451_v32  ;;  %v1708_v39 = vpop.f32.mrf.mxu1 }
 0x1a4   :  { %v1669_v38 = vpop.f32.mrf.mxu0 }
 0x1a5   :  { %v1957_v41 = vmul.f32 0.5, %v1707_v42  ;;  %v1709_v44 = vadd.f32 %v1708_v39, %v1668_v37  ;;  %v1710_v45 = vpop.f32.mrf.mxu1  ;;  %v470_v38 = vsub.s32 6, %v2920_v13 }
 0x1a6   :  { %v1670_v46 = vpop.f32.mrf.mxu0 }
 0x1a7   :  { %2650 = vtanh.f32 %v1957_v41  ;;  %v1958_v47 = vmul.f32 0.5, %v1709_v44  ;;  %v1711_v48 = vpop.f32.mrf.mxu1  ;;  %v471_v45 = vrot.slane %v3438_v30, %v470_v38 }
 0x1a9   :  { %2652 = vtanh.f32 %v1958_v47 }
 0x1b4   :  { %v2651_v14 = vpop.eup %2650 }
 0x1b5   :  { %v1971_v49 = vadd.f32 1.0, %v2651_v14 }
 0x1b6   :  { %v2653_v50 = vpop.eup %2652 }
 0x1b7   :  { %v1972_v17 = vadd.f32 1.0, %v2653_v50  ;;  %v1978_v51 = vmul.f32 0.5, %v1971_v49 }
 0x1b9   :  { %v1979_v52 = vmul.f32 0.5, %v1972_v17 }
 0x1bb   :  { %v2261_v53 = vpack.c.bf16 %v1979_v52, %v1978_v51 }
 0x1bd   :  { %2014 = vst [vmem:[%s3475_s5] sm:$0xff] %v2261_v53 }
 0x1e0   :  { %v1747_v56 = vpop.f32.mrf.mxu0 }
 0x1e1   :  { %v1748_v57 = vadd.f32 %v1747_v56, %v455_v54  ;;  %v1788_v58 = vpop.f32.mrf.mxu1 }
 0x1e2   :  { %v1749_v59 = vpop.f32.mrf.mxu0 }
 0x1e3   :  { %v1789_v60 = vadd.f32 %v1788_v58, %v1748_v57  ;;  %v1750_v61 = vadd.f32 %v1749_v59, %v459_v55  ;;  %v1790_v62 = vpop.f32.mrf.mxu1 }
 0x1e4   :  { %v1751_v63 = vpop.f32.mrf.mxu0 }
 0x1e5   :  { %v1959_v0 = vmul.f32 0.5, %v1789_v60  ;;  %v1791_v1 = vadd.f32 %v1790_v62, %v1750_v61  ;;  %v1792_v2 = vpop.f32.mrf.mxu1 }
 0x1e6   :  { %v1752_v3 = vpop.f32.mrf.mxu0 }
 0x1e7   :  { %2654 = vtanh.f32 %v1959_v0  ;;  %v1960_v4 = vmul.f32 0.5, %v1791_v1  ;;  %v1793_v40 = vpop.f32.mrf.mxu1 }
 0x1e9   :  { %2656 = vtanh.f32 %v1960_v4 }
 0x1f4   :  { %v2655_v15 = vpop.eup %2654 }
 0x1f5   :  { %v1973_v5 = vadd.f32 1.0, %v2655_v15 }
 0x1f6   :  { %v2657_v43 = vpop.eup %2656 }
 0x1f7   :  { %v1974_v18 = vadd.f32 1.0, %v2657_v43  ;;  %v1980_v6 = vmul.f32 0.5, %v1973_v5 }
 0x1f9   :  { %v1981_v7 = vmul.f32 0.5, %v1974_v18 }
 0x1fb   :  { %v2262_v8 = vpack.c.bf16 %v1981_v7, %v1980_v6 }
 0x1fd   :  { %2015 = vst [vmem:[%s3475_s5 + $0x8] sm:$0xff] %v2262_v8 }
 0x220   :  { %v1829_v16 = vpop.f32.mrf.mxu0 }
 0x221   :  { %v1830_v19 = vadd.f32 %v1829_v16, %v463_v11  ;;  %v1870_v20 = vpop.f32.mrf.mxu1 }
 0x222   :  { %v1831_v21 = vpop.f32.mrf.mxu0 }
 0x223   :  { %v1871_v22 = vadd.f32 %v1870_v20, %v1830_v19  ;;  %v1832_v23 = vadd.f32 %v1831_v21, %v467_v12  ;;  %v1872_v24 = vpop.f32.mrf.mxu1 }
 0x224   :  { %v1833_v25 = vpop.f32.mrf.mxu0 }
 0x225   :  { %v1961_v26 = vmul.f32 0.5, %v1871_v22  ;;  %v1873_v27 = vadd.f32 %v1872_v24, %v1832_v23  ;;  %v1874_v28 = vpop.f32.mrf.mxu1 }
 0x226   :  { %v1834_v29 = vpop.f32.mrf.mxu0 }
 0x227   :  { %2658 = vtanh.f32 %v1961_v26  ;;  %v1962_v31 = vmul.f32 0.5, %v1873_v27  ;;  %v1875_v32 = vpop.f32.mrf.mxu1 }
 0x229   :  { %2660 = vtanh.f32 %v1962_v31 }
 0x234   :  { %v2659_v33 = vpop.eup %2658 }
 0x235   :  { %v1975_v34 = vadd.f32 1.0, %v2659_v33 }
 0x236   :  { %v2661_v35 = vpop.eup %2660 }
 0x237   :  { %v1976_v36 = vadd.f32 1.0, %v2661_v35  ;;  %v1982_v42 = vmul.f32 0.5, %v1975_v34 }
 0x239   :  { %v1983_v37 = vmul.f32 0.5, %v1976_v36 }
 0x23b   :  { %v2263_v39 = vpack.c.bf16 %v1983_v37, %v1982_v42 }
 0x23d   :  { %2016 = vst [vmem:[%s3475_s5 + $0x10] sm:$0xff] %v2263_v39 }
 0x240   :  { %v2281_v41 = vpop.f32.mrf.mxu0 }
 0x241   :  { %v2303_v44 = vpop.f32.mrf.mxu1 }
 0x242   :  { %v2282_v46 = vpop.f32.mrf.mxu0 }
 0x243   :  { %v2283_v47 = vadd.f32 %v2282_v46, %v2281_v41  ;;  %v2304_v48 = vpop.f32.mrf.mxu1 }
 0x244   :  { %v2284_v14 = vpop.f32.mrf.mxu0  ;;  %v2305_v50 = vadd.f32 %v2304_v48, %v2303_v44 }
 0x245   :  { %v1912_v49 = vadd.f32 %v2283_v47, %v471_v45  ;;  %v2306_v17 = vpop.f32.mrf.mxu1 }
 0x246   :  { %v2285_v51 = vpop.f32.mrf.mxu0 }
 0x247   :  { %v1952_v52 = vadd.f32 %v2305_v50, %v1912_v49  ;;  %v2307_v53 = vpop.f32.mrf.mxu1 }
 0x249   :  { %v1963_v54 = vmul.f32 0.5, %v1952_v52 }
 0x24b   :  { %2662 = vtanh.f32 %v1963_v54 }
 0x258   :  { %v2663_v55 = vpop.eup %2662 }
 0x259   :  { %v1977_v56 = vadd.f32 1.0, %v2663_v55 }
 0x25b   :  { %v1984_v57 = vmul.f32 0.5, %v1977_v56 }
 0x25d   :  { %v2264_v13 = vpack.c.bf16 %v1984_v57, %v1984_v57 }
 0x25f   :  { %2018 = vst.msk [vmem:[%s3475_s5 + $0x18] sm:$0xf] %vm2017_vm1, %v2264_v13 }

</bundles_post_ra>
